<compile_context>
chip_gen: v6e
topology: v6e:2x2x1
jax: 0.10.0
libtpu: 0.0.40
codegen_flags: <defaults>
</compile_context>

<pallas_src>
import jax
import jax.numpy as jnp
from jax import lax
from jax.experimental import pallas as pl
from jax.experimental.pallas import tpu as pltpu


def lstm_tagger_kernel(ids_ref, emb_ref, wih_ref, whh_ref, b_ref,
                       wout_ref, bout_ref, out_ref):
    S, _ = out_ref.shape
    V, _ = emb_ref.shape
    H = whh_ref.shape[0]

    # ---- fused embedding gather: one-hot matmul on the MXU (prologue) ----
    ids = ids_ref[...]                                              # (S, 1) int32
    onehot = (ids == lax.broadcasted_iota(jnp.int32, (S, V), 1)
              ).astype(jnp.float32)                                 # (S, V)
    x_emb = jnp.dot(onehot, emb_ref[...],
                    preferred_element_type=jnp.float32)             # (S, E)

    # ---- hoisted input projection: all timesteps in one matmul ----
    x_pre = (jnp.dot(x_emb, wih_ref[...],
                     preferred_element_type=jnp.float32)
             + b_ref[...])                                          # (S, 4H)

    whh = whh_ref[...]                                              # (H, 4H)

    # ---- recurrence, fully unrolled (S is static & small) ----
    h = jnp.zeros((1, H), jnp.float32)
    c = jnp.zeros((1, H), jnp.float32)
    h_rows = []
    for t in range(S):
        gates = x_pre[t:t + 1, :] + jnp.dot(h, whh,
                                            preferred_element_type=jnp.float32)  # (1, 4H)
        # two full-vreg transcendentals instead of four sub-vreg ones
        sig = jax.nn.sigmoid(gates)
        tnh = jnp.tanh(gates)
        i_g = sig[:, 0 * H:1 * H]
        f_g = sig[:, 1 * H:2 * H]
        g_g = tnh[:, 2 * H:3 * H]
        o_g = sig[:, 3 * H:4 * H]
        c = f_g * c + i_g * g_g
        h = o_g * jnp.tanh(c)
        h_rows.append(h)

    h_all = jnp.concatenate(h_rows, axis=0)                         # (S, H), one store path

    # ---- out2tag + log_softmax over the tag dimension (last axis) ----
    logits = (jnp.dot(h_all, wout_ref[...],
                      preferred_element_type=jnp.float32)
              + bout_ref[...])                                      # (S, T)
    m = jnp.max(logits, axis=-1, keepdims=True)
    shifted = logits - m
    lse = jnp.log(jnp.sum(jnp.exp(shifted), axis=-1, keepdims=True))
    out_ref[...] = shifted - lse


@jax.jit
def lstm_tagger_forward(token_ids, params):
    emb_table = params["embedding"]                   # (V, E)
    S = token_ids.shape[0]
    T = params["b_out"].shape[-1]
    ids2d = token_ids.astype(jnp.int32).reshape(S, 1)

    vmem_spec = pl.BlockSpec(memory_space=pltpu.MemorySpace.VMEM)
    out = pl.pallas_call(
        lstm_tagger_kernel,
        out_shape=jax.ShapeDtypeStruct((S, T), jnp.float32),
        in_specs=[vmem_spec] * 7,
        out_specs=vmem_spec,
    )(ids2d, emb_table, params["w_ih"], params["w_hh"], params["b"],
      params["w_out"], params["b_out"])
    return out


def make_params(key, vocab_size, embedding_dim, hidden_dim, target_size):
    ks = jax.random.split(key, 7)
    scale = 0.1
    emb = jax.random.normal(ks[0], (vocab_size, embedding_dim), jnp.float32) * scale
    # PyTorch LSTM weights: weight_ih (4H, E), weight_hh (4H, H), gate order i,f,g,o
    w_ih = jax.random.normal(ks[1], (4 * hidden_dim, embedding_dim), jnp.float32) * scale
    w_hh = jax.random.normal(ks[2], (4 * hidden_dim, hidden_dim), jnp.float32) * scale
    b_ih = jax.random.normal(ks[3], (4 * hidden_dim,), jnp.float32) * scale
    b_hh = jax.random.normal(ks[4], (4 * hidden_dim,), jnp.float32) * scale
    w_out = jax.random.normal(ks[5], (target_size, hidden_dim), jnp.float32) * scale
    b_out = jax.random.normal(ks[6], (target_size,), jnp.float32) * scale
    return {
        "embedding": emb,
        "w_ih": jnp.transpose(w_ih),                 # (E, 4H)
        "w_hh": jnp.transpose(w_hh),                 # (H, 4H)
        "b": (b_ih + b_hh).reshape(1, -1),           # (1, 4H)
        "w_out": jnp.transpose(w_out),               # (H, T)
        "b_out": b_out.reshape(1, -1),               # (1, T)
    }


def reference_forward(token_ids, params):
    """Pure-JAX reference matching torch.nn.LSTM + Linear + LogSoftmax semantics."""
    x = params["embedding"][token_ids]               # (S, E)
    H = params["w_hh"].shape[0]

    def step(carry, x_t):
        h, c = carry
        gates = x_t @ params["w_ih"] + h @ params["w_hh"] + params["b"][0]
        i_g = jax.nn.sigmoid(gates[0 * H:1 * H])
        f_g = jax.nn.sigmoid(gates[1 * H:2 * H])
        g_g = jnp.tanh(gates[2 * H:3 * H])
        o_g = jax.nn.sigmoid(gates[3 * H:4 * H])
        c_new = f_g * c + i_g * g_g
        h_new = o_g * jnp.tanh(c_new)
        return (h_new, c_new), h_new

    h0 = jnp.zeros((H,), jnp.float32)
    _, hs = lax.scan(step, (h0, h0), x)              # (S, H)
    logits = hs @ params["w_out"] + params["b_out"]  # (S, T)
    return jax.nn.log_softmax(logits, axis=-1)


if __name__ == "__main__":
    # Small shapes consistent with the module: seq=8, vocab=20, embed=16, hidden=32, tags=8
    SEQ_LEN, VOCAB, EMB, HID, TAGS = 8, 20, 16, 32, 8

    key = jax.random.PRNGKey(0)
    k_tok, k_par = jax.random.split(key)
    token_ids = jax.random.randint(k_tok, (SEQ_LEN,), 0, VOCAB, dtype=jnp.int32)
    params = make_params(k_par, VOCAB, EMB, HID, TAGS)

    out = lstm_tagger_forward(token_ids, params)
    out = jax.block_until_ready(out)

    ref = reference_forward(token_ids, params)
    assert out.shape == (SEQ_LEN, TAGS)
    assert jnp.allclose(out, ref, atol=1e-4, rtol=1e-4)

    print("KERNEL_OK")
</pallas_src>

<mosaic_0001>
module attributes {stable_mosaic.version = 11 : i64} {
  func.func @lstm_tagger_kernel(%arg0: memref<8x1xi32, #tpu.memory_space<vmem>>, %arg1: memref<20x16xf32, #tpu.memory_space<vmem>>, %arg2: memref<16x128xf32, #tpu.memory_space<vmem>>, %arg3: memref<32x128xf32, #tpu.memory_space<vmem>>, %arg4: memref<1x128xf32, #tpu.memory_space<vmem>>, %arg5: memref<32x8xf32, #tpu.memory_space<vmem>>, %arg6: memref<1x8xf32, #tpu.memory_space<vmem>>, %arg7: memref<8x8xf32, #tpu.memory_space<vmem>>) attributes {dimension_semantics = [], scalar_prefetch = 0 : i64, scratch_operands = 0 : i64, tpu.core_type = #tpu.core_type<tc>} {
    %c0 = arith.constant 0 : index
    %c0_0 = arith.constant 0 : index
    %0 = vector.load %arg0[%c0, %c0_0] : memref<8x1xi32, #tpu.memory_space<vmem>>, vector<8x1xi32>
    %1 = tpu.iota {dimensions = array<i32: 1>} : vector<8x20xi32>
    %2 = vector.broadcast %0 : vector<8x1xi32> to vector<8x20xi32>
    %3 = arith.cmpi eq, %2, %1 : vector<8x20xi32>
    %4 = arith.extui %3 : vector<8x20xi1> to vector<8x20xi32>
    %5 = arith.sitofp %4 : vector<8x20xi32> to vector<8x20xf32>
    %c0_1 = arith.constant 0 : index
    %c0_2 = arith.constant 0 : index
    %6 = vector.load %arg1[%c0_1, %c0_2] : memref<20x16xf32, #tpu.memory_space<vmem>>, vector<20x16xf32>
    %cst = arith.constant dense<0.000000e+00> : vector<8x16xf32>
    %7 = tpu.matmul %5, %6, %cst {dimension_numbers = #tpu.dot_dimension_numbers<[1], [0], [0], [1], [0, 0, 1, 1], [], []>} : vector<8x20xf32>, vector<20x16xf32>, vector<8x16xf32> -> vector<8x16xf32>
    %c0_3 = arith.constant 0 : index
    %c0_4 = arith.constant 0 : index
    %8 = vector.load %arg2[%c0_3, %c0_4] : memref<16x128xf32, #tpu.memory_space<vmem>>, vector<16x128xf32>
    %cst_5 = arith.constant dense<0.000000e+00> : vector<8x128xf32>
    %9 = tpu.matmul %7, %8, %cst_5 {dimension_numbers = #tpu.dot_dimension_numbers<[1], [0], [0], [1], [0, 0, 1, 1], [], []>} : vector<8x16xf32>, vector<16x128xf32>, vector<8x128xf32> -> vector<8x128xf32>
    %c0_6 = arith.constant 0 : index
    %c0_7 = arith.constant 0 : index
    %10 = vector.load %arg4[%c0_6, %c0_7] : memref<1x128xf32, #tpu.memory_space<vmem>>, vector<1x128xf32>
    %11 = vector.broadcast %10 : vector<1x128xf32> to vector<8x128xf32>
    %12 = arith.addf %9, %11 : vector<8x128xf32>
    %c0_8 = arith.constant 0 : index
    %c0_9 = arith.constant 0 : index
    %13 = vector.load %arg3[%c0_8, %c0_9] : memref<32x128xf32, #tpu.memory_space<vmem>>, vector<32x128xf32>
    %cst_10 = arith.constant 0.000000e+00 : f32
    %14 = vector.broadcast %cst_10 : f32 to vector<1x32xf32>
    %cst_11 = arith.constant 0.000000e+00 : f32
    %15 = vector.broadcast %cst_11 : f32 to vector<1x32xf32>
    %16 = vector.extract_strided_slice %12 {offsets = [0, 0], sizes = [1, 128], strides = [1, 1]} : vector<8x128xf32> to vector<1x128xf32>
    %cst_12 = arith.constant dense<0.000000e+00> : vector<1x128xf32>
    %17 = tpu.matmul %14, %13, %cst_12 {dimension_numbers = #tpu.dot_dimension_numbers<[1], [0], [0], [1], [0, 0, 1, 1], [], []>} : vector<1x32xf32>, vector<32x128xf32>, vector<1x128xf32> -> vector<1x128xf32>
    %18 = arith.addf %16, %17 : vector<1x128xf32>
    %19 = arith.negf %18 : vector<1x128xf32>
    %20 = math.exp %19 : vector<1x128xf32>
    %cst_13 = arith.constant 1.000000e+00 : f32
    %21 = vector.broadcast %cst_13 : f32 to vector<1x128xf32>
    %22 = arith.addf %21, %20 : vector<1x128xf32>
    %23 = arith.divf %21, %22 : vector<1x128xf32>
    %24 = math.tanh %18 : vector<1x128xf32>
    %25 = vector.extract_strided_slice %23 {offsets = [0, 0], sizes = [1, 32], strides = [1, 1]} : vector<1x128xf32> to vector<1x32xf32>
    %26 = vector.extract_strided_slice %23 {offsets = [0, 32], sizes = [1, 32], strides = [1, 1]} : vector<1x128xf32> to vector<1x32xf32>
    %27 = vector.extract_strided_slice %24 {offsets = [0, 64], sizes = [1, 32], strides = [1, 1]} : vector<1x128xf32> to vector<1x32xf32>
    %28 = vector.extract_strided_slice %23 {offsets = [0, 96], sizes = [1, 32], strides = [1, 1]} : vector<1x128xf32> to vector<1x32xf32>
    %29 = arith.mulf %26, %15 : vector<1x32xf32>
    %30 = arith.mulf %25, %27 : vector<1x32xf32>
    %31 = arith.addf %29, %30 : vector<1x32xf32>
    %32 = math.tanh %31 : vector<1x32xf32>
    %33 = arith.mulf %28, %32 : vector<1x32xf32>
    %34 = vector.extract_strided_slice %12 {offsets = [1, 0], sizes = [1, 128], strides = [1, 1]} : vector<8x128xf32> to vector<1x128xf32>
    %cst_14 = arith.constant dense<0.000000e+00> : vector<1x128xf32>
    %35 = tpu.matmul %33, %13, %cst_14 {dimension_numbers = #tpu.dot_dimension_numbers<[1], [0], [0], [1], [0, 0, 1, 1], [], []>} : vector<1x32xf32>, vector<32x128xf32>, vector<1x128xf32> -> vector<1x128xf32>
    %36 = arith.addf %34, %35 : vector<1x128xf32>
    %37 = arith.negf %36 : vector<1x128xf32>
    %38 = math.exp %37 : vector<1x128xf32>
    %cst_15 = arith.constant 1.000000e+00 : f32
    %39 = vector.broadcast %cst_15 : f32 to vector<1x128xf32>
    %40 = arith.addf %39, %38 : vector<1x128xf32>
    %41 = arith.divf %39, %40 : vector<1x128xf32>
    %42 = math.tanh %36 : vector<1x128xf32>
    %43 = vector.extract_strided_slice %41 {offsets = [0, 0], sizes = [1, 32], strides = [1, 1]} : vector<1x128xf32> to vector<1x32xf32>
    %44 = vector.extract_strided_slice %41 {offsets = [0, 32], sizes = [1, 32], strides = [1, 1]} : vector<1x128xf32> to vector<1x32xf32>
    %45 = vector.extract_strided_slice %42 {offsets = [0, 64], sizes = [1, 32], strides = [1, 1]} : vector<1x128xf32> to vector<1x32xf32>
    %46 = vector.extract_strided_slice %41 {offsets = [0, 96], sizes = [1, 32], strides = [1, 1]} : vector<1x128xf32> to vector<1x32xf32>
    %47 = arith.mulf %44, %31 : vector<1x32xf32>
    %48 = arith.mulf %43, %45 : vector<1x32xf32>
    %49 = arith.addf %47, %48 : vector<1x32xf32>
    %50 = math.tanh %49 : vector<1x32xf32>
    %51 = arith.mulf %46, %50 : vector<1x32xf32>
    %52 = vector.extract_strided_slice %12 {offsets = [2, 0], sizes = [1, 128], strides = [1, 1]} : vector<8x128xf32> to vector<1x128xf32>
    %cst_16 = arith.constant dense<0.000000e+00> : vector<1x128xf32>
    %53 = tpu.matmul %51, %13, %cst_16 {dimension_numbers = #tpu.dot_dimension_numbers<[1], [0], [0], [1], [0, 0, 1, 1], [], []>} : vector<1x32xf32>, vector<32x128xf32>, vector<1x128xf32> -> vector<1x128xf32>
    %54 = arith.addf %52, %53 : vector<1x128xf32>
    %55 = arith.negf %54 : vector<1x128xf32>
    %56 = math.exp %55 : vector<1x128xf32>
    %cst_17 = arith.constant 1.000000e+00 : f32
    %57 = vector.broadcast %cst_17 : f32 to vector<1x128xf32>
    %58 = arith.addf %57, %56 : vector<1x128xf32>
    %59 = arith.divf %57, %58 : vector<1x128xf32>
    %60 = math.tanh %54 : vector<1x128xf32>
    %61 = vector.extract_strided_slice %59 {offsets = [0, 0], sizes = [1, 32], strides = [1, 1]} : vector<1x128xf32> to vector<1x32xf32>
    %62 = vector.extract_strided_slice %59 {offsets = [0, 32], sizes = [1, 32], strides = [1, 1]} : vector<1x128xf32> to vector<1x32xf32>
    %63 = vector.extract_strided_slice %60 {offsets = [0, 64], sizes = [1, 32], strides = [1, 1]} : vector<1x128xf32> to vector<1x32xf32>
    %64 = vector.extract_strided_slice %59 {offsets = [0, 96], sizes = [1, 32], strides = [1, 1]} : vector<1x128xf32> to vector<1x32xf32>
    %65 = arith.mulf %62, %49 : vector<1x32xf32>
    %66 = arith.mulf %61, %63 : vector<1x32xf32>
    %67 = arith.addf %65, %66 : vector<1x32xf32>
    %68 = math.tanh %67 : vector<1x32xf32>
    %69 = arith.mulf %64, %68 : vector<1x32xf32>
    %70 = vector.extract_strided_slice %12 {offsets = [3, 0], sizes = [1, 128], strides = [1, 1]} : vector<8x128xf32> to vector<1x128xf32>
    %cst_18 = arith.constant dense<0.000000e+00> : vector<1x128xf32>
    %71 = tpu.matmul %69, %13, %cst_18 {dimension_numbers = #tpu.dot_dimension_numbers<[1], [0], [0], [1], [0, 0, 1, 1], [], []>} : vector<1x32xf32>, vector<32x128xf32>, vector<1x128xf32> -> vector<1x128xf32>
    %72 = arith.addf %70, %71 : vector<1x128xf32>
    %73 = arith.negf %72 : vector<1x128xf32>
    %74 = math.exp %73 : vector<1x128xf32>
    %cst_19 = arith.constant 1.000000e+00 : f32
    %75 = vector.broadcast %cst_19 : f32 to vector<1x128xf32>
    %76 = arith.addf %75, %74 : vector<1x128xf32>
    %77 = arith.divf %75, %76 : vector<1x128xf32>
    %78 = math.tanh %72 : vector<1x128xf32>
    %79 = vector.extract_strided_slice %77 {offsets = [0, 0], sizes = [1, 32], strides = [1, 1]} : vector<1x128xf32> to vector<1x32xf32>
    %80 = vector.extract_strided_slice %77 {offsets = [0, 32], sizes = [1, 32], strides = [1, 1]} : vector<1x128xf32> to vector<1x32xf32>
    %81 = vector.extract_strided_slice %78 {offsets = [0, 64], sizes = [1, 32], strides = [1, 1]} : vector<1x128xf32> to vector<1x32xf32>
    %82 = vector.extract_strided_slice %77 {offsets = [0, 96], sizes = [1, 32], strides = [1, 1]} : vector<1x128xf32> to vector<1x32xf32>
    %83 = arith.mulf %80, %67 : vector<1x32xf32>
    %84 = arith.mulf %79, %81 : vector<1x32xf32>
    %85 = arith.addf %83, %84 : vector<1x32xf32>
    %86 = math.tanh %85 : vector<1x32xf32>
    %87 = arith.mulf %82, %86 : vector<1x32xf32>
    %88 = vector.extract_strided_slice %12 {offsets = [4, 0], sizes = [1, 128], strides = [1, 1]} : vector<8x128xf32> to vector<1x128xf32>
    %cst_20 = arith.constant dense<0.000000e+00> : vector<1x128xf32>
    %89 = tpu.matmul %87, %13, %cst_20 {dimension_numbers = #tpu.dot_dimension_numbers<[1], [0], [0], [1], [0, 0, 1, 1], [], []>} : vector<1x32xf32>, vector<32x128xf32>, vector<1x128xf32> -> vector<1x128xf32>
    %90 = arith.addf %88, %89 : vector<1x128xf32>
    %91 = arith.negf %90 : vector<1x128xf32>
    %92 = math.exp %91 : vector<1x128xf32>
    %cst_21 = arith.constant 1.000000e+00 : f32
    %93 = vector.broadcast %cst_21 : f32 to vector<1x128xf32>
    %94 = arith.addf %93, %92 : vector<1x128xf32>
    %95 = arith.divf %93, %94 : vector<1x128xf32>
    %96 = math.tanh %90 : vector<1x128xf32>
    %97 = vector.extract_strided_slice %95 {offsets = [0, 0], sizes = [1, 32], strides = [1, 1]} : vector<1x128xf32> to vector<1x32xf32>
    %98 = vector.extract_strided_slice %95 {offsets = [0, 32], sizes = [1, 32], strides = [1, 1]} : vector<1x128xf32> to vector<1x32xf32>
    %99 = vector.extract_strided_slice %96 {offsets = [0, 64], sizes = [1, 32], strides = [1, 1]} : vector<1x128xf32> to vector<1x32xf32>
    %100 = vector.extract_strided_slice %95 {offsets = [0, 96], sizes = [1, 32], strides = [1, 1]} : vector<1x128xf32> to vector<1x32xf32>
    %101 = arith.mulf %98, %85 : vector<1x32xf32>
    %102 = arith.mulf %97, %99 : vector<1x32xf32>
    %103 = arith.addf %101, %102 : vector<1x32xf32>
    %104 = math.tanh %103 : vector<1x32xf32>
    %105 = arith.mulf %100, %104 : vector<1x32xf32>
    %106 = vector.extract_strided_slice %12 {offsets = [5, 0], sizes = [1, 128], strides = [1, 1]} : vector<8x128xf32> to vector<1x128xf32>
    %cst_22 = arith.constant dense<0.000000e+00> : vector<1x128xf32>
    %107 = tpu.matmul %105, %13, %cst_22 {dimension_numbers = #tpu.dot_dimension_numbers<[1], [0], [0], [1], [0, 0, 1, 1], [], []>} : vector<1x32xf32>, vector<32x128xf32>, vector<1x128xf32> -> vector<1x128xf32>
    %108 = arith.addf %106, %107 : vector<1x128xf32>
    %109 = arith.negf %108 : vector<1x128xf32>
    %110 = math.exp %109 : vector<1x128xf32>
    %cst_23 = arith.constant 1.000000e+00 : f32
    %111 = vector.broadcast %cst_23 : f32 to vector<1x128xf32>
    %112 = arith.addf %111, %110 : vector<1x128xf32>
    %113 = arith.divf %111, %112 : vector<1x128xf32>
    %114 = math.tanh %108 : vector<1x128xf32>
    %115 = vector.extract_strided_slice %113 {offsets = [0, 0], sizes = [1, 32], strides = [1, 1]} : vector<1x128xf32> to vector<1x32xf32>
    %116 = vector.extract_strided_slice %113 {offsets = [0, 32], sizes = [1, 32], strides = [1, 1]} : vector<1x128xf32> to vector<1x32xf32>
    %117 = vector.extract_strided_slice %114 {offsets = [0, 64], sizes = [1, 32], strides = [1, 1]} : vector<1x128xf32> to vector<1x32xf32>
    %118 = vector.extract_strided_slice %113 {offsets = [0, 96], sizes = [1, 32], strides = [1, 1]} : vector<1x128xf32> to vector<1x32xf32>
    %119 = arith.mulf %116, %103 : vector<1x32xf32>
    %120 = arith.mulf %115, %117 : vector<1x32xf32>
    %121 = arith.addf %119, %120 : vector<1x32xf32>
    %122 = math.tanh %121 : vector<1x32xf32>
    %123 = arith.mulf %118, %122 : vector<1x32xf32>
    %124 = vector.extract_strided_slice %12 {offsets = [6, 0], sizes = [1, 128], strides = [1, 1]} : vector<8x128xf32> to vector<1x128xf32>
    %cst_24 = arith.constant dense<0.000000e+00> : vector<1x128xf32>
    %125 = tpu.matmul %123, %13, %cst_24 {dimension_numbers = #tpu.dot_dimension_numbers<[1], [0], [0], [1], [0, 0, 1, 1], [], []>} : vector<1x32xf32>, vector<32x128xf32>, vector<1x128xf32> -> vector<1x128xf32>
    %126 = arith.addf %124, %125 : vector<1x128xf32>
    %127 = arith.negf %126 : vector<1x128xf32>
    %128 = math.exp %127 : vector<1x128xf32>
    %cst_25 = arith.constant 1.000000e+00 : f32
    %129 = vector.broadcast %cst_25 : f32 to vector<1x128xf32>
    %130 = arith.addf %129, %128 : vector<1x128xf32>
    %131 = arith.divf %129, %130 : vector<1x128xf32>
    %132 = math.tanh %126 : vector<1x128xf32>
    %133 = vector.extract_strided_slice %131 {offsets = [0, 0], sizes = [1, 32], strides = [1, 1]} : vector<1x128xf32> to vector<1x32xf32>
    %134 = vector.extract_strided_slice %131 {offsets = [0, 32], sizes = [1, 32], strides = [1, 1]} : vector<1x128xf32> to vector<1x32xf32>
    %135 = vector.extract_strided_slice %132 {offsets = [0, 64], sizes = [1, 32], strides = [1, 1]} : vector<1x128xf32> to vector<1x32xf32>
    %136 = vector.extract_strided_slice %131 {offsets = [0, 96], sizes = [1, 32], strides = [1, 1]} : vector<1x128xf32> to vector<1x32xf32>
    %137 = arith.mulf %134, %121 : vector<1x32xf32>
    %138 = arith.mulf %133, %135 : vector<1x32xf32>
    %139 = arith.addf %137, %138 : vector<1x32xf32>
    %140 = math.tanh %139 : vector<1x32xf32>
    %141 = arith.mulf %136, %140 : vector<1x32xf32>
    %142 = vector.extract_strided_slice %12 {offsets = [7, 0], sizes = [1, 128], strides = [1, 1]} : vector<8x128xf32> to vector<1x128xf32>
    %cst_26 = arith.constant dense<0.000000e+00> : vector<1x128xf32>
    %143 = tpu.matmul %141, %13, %cst_26 {dimension_numbers = #tpu.dot_dimension_numbers<[1], [0], [0], [1], [0, 0, 1, 1], [], []>} : vector<1x32xf32>, vector<32x128xf32>, vector<1x128xf32> -> vector<1x128xf32>
    %144 = arith.addf %142, %143 : vector<1x128xf32>
    %145 = arith.negf %144 : vector<1x128xf32>
    %146 = math.exp %145 : vector<1x128xf32>
    %cst_27 = arith.constant 1.000000e+00 : f32
    %147 = vector.broadcast %cst_27 : f32 to vector<1x128xf32>
    %148 = arith.addf %147, %146 : vector<1x128xf32>
    %149 = arith.divf %147, %148 : vector<1x128xf32>
    %150 = math.tanh %144 : vector<1x128xf32>
    %151 = vector.extract_strided_slice %149 {offsets = [0, 0], sizes = [1, 32], strides = [1, 1]} : vector<1x128xf32> to vector<1x32xf32>
    %152 = vector.extract_strided_slice %149 {offsets = [0, 32], sizes = [1, 32], strides = [1, 1]} : vector<1x128xf32> to vector<1x32xf32>
    %153 = vector.extract_strided_slice %150 {offsets = [0, 64], sizes = [1, 32], strides = [1, 1]} : vector<1x128xf32> to vector<1x32xf32>
    %154 = vector.extract_strided_slice %149 {offsets = [0, 96], sizes = [1, 32], strides = [1, 1]} : vector<1x128xf32> to vector<1x32xf32>
    %155 = arith.mulf %152, %139 : vector<1x32xf32>
    %156 = arith.mulf %151, %153 : vector<1x32xf32>
    %157 = arith.addf %155, %156 : vector<1x32xf32>
    %158 = math.tanh %157 : vector<1x32xf32>
    %159 = arith.mulf %154, %158 : vector<1x32xf32>
    %160 = tpu.concatenate %33, %51, %69, %87, %105, %123, %141, %159 in 0 : vector<1x32xf32>, vector<1x32xf32>, vector<1x32xf32>, vector<1x32xf32>, vector<1x32xf32>, vector<1x32xf32>, vector<1x32xf32>, vector<1x32xf32> -> vector<8x32xf32>
    %c0_28 = arith.constant 0 : index
    %c0_29 = arith.constant 0 : index
    %161 = vector.load %arg5[%c0_28, %c0_29] : memref<32x8xf32, #tpu.memory_space<vmem>>, vector<32x8xf32>
    %cst_30 = arith.constant dense<0.000000e+00> : vector<8x8xf32>
    %162 = tpu.matmul %160, %161, %cst_30 {dimension_numbers = #tpu.dot_dimension_numbers<[1], [0], [0], [1], [0, 0, 1, 1], [], []>} : vector<8x32xf32>, vector<32x8xf32>, vector<8x8xf32> -> vector<8x8xf32>
    %c0_31 = arith.constant 0 : index
    %c0_32 = arith.constant 0 : index
    %163 = vector.load %arg6[%c0_31, %c0_32] : memref<1x8xf32, #tpu.memory_space<vmem>>, vector<1x8xf32>
    %164 = vector.broadcast %163 : vector<1x8xf32> to vector<8x8xf32>
    %165 = arith.addf %162, %164 : vector<8x8xf32>
    %cst_33 = arith.constant dense<0xFF800000> : vector<8xf32>
    %166 = vector.multi_reduction <maximumf>, %165, %cst_33 [1] : vector<8x8xf32> to vector<8xf32>
    %167 = vector.shape_cast %166 : vector<8xf32> to vector<8x1xf32>
    %168 = vector.broadcast %167 : vector<8x1xf32> to vector<8x8xf32>
    %169 = arith.subf %165, %168 : vector<8x8xf32>
    %170 = math.exp %169 : vector<8x8xf32>
    %cst_34 = arith.constant dense<0.000000e+00> : vector<8xf32>
    %171 = vector.multi_reduction <add>, %170, %cst_34 [1] : vector<8x8xf32> to vector<8xf32>
    %172 = vector.shape_cast %171 : vector<8xf32> to vector<8x1xf32>
    %173 = math.log %172 : vector<8x1xf32>
    %174 = vector.broadcast %173 : vector<8x1xf32> to vector<8x8xf32>
    %175 = arith.subf %169, %174 : vector<8x8xf32>
    %c0_35 = arith.constant 0 : index
    %c0_36 = arith.constant 0 : index
    %176 = vector.load %arg7[%c0_35, %c0_36] : memref<8x8xf32, #tpu.memory_space<vmem>>, vector<8x8xf32>
    tpu.vector_store %arg7[%c0_35, %c0_36], %175 {strides = array<i32>} : memref<8x8xf32, #tpu.memory_space<vmem>>, vector<8x8xf32>,
    return
  }
}

</mosaic_0001>

<bundles_post_ra>
// kernel: lstm_tagger_forward.1
= control target key start
LH: loop header
LB: loop body
LE: loop exit
PB: predicated region body
PF: predicated region fallthrough
CT: control target
= control target key end

     0   :  { %vm43_vm0 = vcmask 1043456   ;;  %v1464_v2 = vmov 0   ;;  %v1465_v3 = vmov 0.0   ;;  %vm1466_vm1 = vmmov 0   ;;  %s1725_s0 = inlined_call_operand.vmem [shape: s32[8,1], index: 0, kind: input, shape index: {}]   ;;  %s1726_s1 = inlined_call_operand.vmem [shape: f32[20,16], index: 1, kind: input, shape index: {}]   ;;  %s1727_s2 = inlined_call_operand.vmem [shape: f32[16,128], index: 2, kind: input, shape index: {}]   ;;  %s1728_s3 = inlined_call_operand.vmem [shape: f32[32,128], index: 3, kind: input, shape index: {}]   ;;  %s1729_s4 = inlined_call_operand.vmem [shape: f32[1,128], index: 4, kind: input, shape index: {}]   ;;  %s1730_s5 = inlined_call_operand.vmem [shape: f32[32,8], index: 5, kind: input, shape index: {}]   ;;  %s1731_s6 = inlined_call_operand.vmem [shape: f32[1,8], index: 6, kind: input, shape index: {}]   ;;  %s1732_s7 = inlined_call_operand.hbm [shape: f32[8,8], index: 7, kind: output, shape index: {}]  }
   0x1   :  { %v27_v0 = vld [vmem:[%s1725_s0] sm:$0xff]  ;;  %v38_v1 = vld [vmem:[%s1726_s1 + $0x10] sm:$0xf]  ;;  %1373 = vset.pattern.permute.xlu0 %v1464_v2  ;;  %1252 = vmatprep.subr.mxu0 %v1465_v3  ;;  %v37_v4 = vld [vmem:[%s1726_s1 + $0x8] sm:$0xff] }
   0x2   :  { %31 = vperm.xlu0 %1373, %v27_v0   ;;  %1253 = vmatpush3.msk.msra.mxu0 %vm43_vm0, %v38_v1  ;;  %v1524_v5 = vld [vmem:[%s1728_s3 + $0x18] sm:$0xff]  ;;  %v36_v6 = vld [vmem:[%s1726_s1] sm:$0xff] }
   0x3   :  { %1254 = vmatprep.subr.mxu0 %v1465_v3  ;;  %1258 = vmatprep.mubr.msk.f32.mxu0 %vm1466_vm1, %v1465_v3 }
   0x4   :  { %12 = vsyncpa [#allocation3], 0  ;;  %1255 = vmatpush3.msra.mxu0 %v37_v4  ;;  %1268 = vmatprep.subr.mxu1 %v1465_v3  ;;  %v1536_v7 = vld [vmem:[%s1728_s3 + $0x10] sm:$0xff]  ;;  %v1544_v8 = vld [vmem:[%s1728_s3 + $0x8] sm:$0xff]  ;;  %v28_v9 = vlaneseq  ;;  %vm39_vm2 = vcmask 162816   ;;  %vm126_vm4 = vcmask 130048  }
   0x5   :  { %1256 = vmatprep.subr.mxu0 %v1465_v3  ;;  %1269 = vmatpush3.msra.mxu1 %v1524_v5  ;;  %v118_v12 = vld [vmem:[%s1727_s2 + $0x8] sm:$0xff]  ;;  %v117_v14 = vld [vmem:[%s1727_s2] sm:$0xff]  ;;  %s1467_s19 = smov 64   ;;  %vm204_vm5 = vcmask 261120   ;;  %vm1051_vm6 = vcmask 1040384   ;;  %vm1053_vm7 = vcmask 1041408  }
   0x6   :  { %1257 = vmatpush3.msra.mxu0 %v36_v6  ;;  %1270 = vmatprep.subr.mxu1 %v1465_v3  ;;  %v29_v10 = vand.u32 127, %v28_v9  ;;  %v1567_v15 = vld [vmem:[%s1728_s3] sm:$0xff]  ;;  %vm1055_vm8 = vcmask 1042432   ;;  %vm1058_vm9 = vcmask 1044480   ;;  %vm1060_vm10 = vcmask 1045504  }
   0x7   :  { %1261 = vmatprep.subr.mxu0 %v1465_v3  ;;  %1271 = vmatpush3.msra.mxu1 %v1536_v7  ;;  %v1181_v20 = vld [vmem:[%s1729_s4] ss:$0 sm:$0xff]  ;;  %s1468_s4 = smov 32   ;;  %vm1062_vm11 = vcmask 1046528   ;;  %vm1150_vm12 = vcmask 64512  }
   0x8   :  { %1272 = vmatprep.subr.mxu1 %v1465_v3  ;;  %1276 = vmatprep.mubr.msk.f32.mxu1 %vm1466_vm1, %v1465_v3 }
   0x9   :  { %1273 = vmatpush3.msra.mxu1 %v1544_v8 }
   0xa   :  { %1274 = vmatprep.subr.mxu1 %v1465_v3 }
   0xb   :  { %1275 = vmatpush3.msra.mxu1 %v1567_v15 }
   0xc   :  { %1277 = vmatmul.mubr.f32.vlgmr.msra.gmra.mxu1 %v1465_v3  ;;  %1290 = vmatprep.subr.mxu1 %v1465_v3 }
   0xd   :  { %1291 = vmatpush3.msra.mxu1 %v1524_v5  ;;  %1298 = vmatprep.mubr.msk.f32.mxu1 %vm1466_vm1, %v1465_v3 }
   0xe   :  { %1292 = vmatprep.subr.mxu1 %v1465_v3 }
   0xf   :  { %1293 = vmatpush3.msra.mxu1 %v1536_v7 }
  0x10   :  { %1294 = vmatprep.subr.mxu1 %v1465_v3 }
  0x11   :  { %1295 = vmatpush3.msra.mxu1 %v1544_v8 }
  0x12   :  { %1296 = vmatprep.subr.mxu1 %v1465_v3 }
  0x13   :  { %1297 = vmatpush3.msra.mxu1 %v1567_v15 }
  0x14   :  { %1312 = vmatprep.subr.mxu1 %v1465_v3 }
  0x7d   :  { %v32_v11 = vpop.permute.xlu0 %31 }
  0x7e   :  { %vm33_vm3 = vcmp.eq.s32.totalorder %v32_v11, %v29_v10 }
  0x7f   :  { %v1178_v13 = vsel %vm33_vm3, 1.0, %v1465_v3 }
  0x80   :  { %1259 = vmatmul.mubr.msk.f32.vlgmr.msra.gmra.mxu0 %vm39_vm2, %v1178_v13 }
  0x81   :  { %1262 = vmatpush3.msra.mxu0 %v118_v12  ;;  %1265 = vmatprep.mubr.msk.f32.mxu0 %vm1466_vm1, %v1465_v3 }
  0x82   :  { %1263 = vmatprep.subr.mxu0 %v1465_v3 }
  0x83   :  { %1264 = vmatpush3.msra.mxu0 %v117_v14 }
  0x84   :  { %1279 = vmatprep.subr.mxu0 %v1465_v3 }
  0xcc   :  { %v274_v18 = vpop.f32.mrf.mxu1 }
  0xce   :  { %v1278_v19 = vpop.f32.mrf.mxu1 }
 0x140   :  { %v113_v16 = vpop.f32.mrf.mxu0 }
 0x141   :  { %1266 = vmatmul.mubr.msk.f32.vlgmr.msra.gmra.mxu0 %vm126_vm4, %v113_v16 }
 0x142   :  { %v1260_v17 = vpop.f32.mrf.mxu0  ;;  %1280 = vmatpush3.msra.mxu0 %v1524_v5  ;;  %1287 = vmatprep.mubr.msk.f32.mxu0 %vm1466_vm1, %v1465_v3 }
 0x143   :  { %1281 = vmatprep.subr.mxu0 %v1465_v3 }
 0x144   :  { %1282 = vmatpush3.msra.mxu0 %v1536_v7 }
 0x145   :  { %1283 = vmatprep.subr.mxu0 %v1465_v3 }
 0x146   :  { %1284 = vmatpush3.msra.mxu0 %v1544_v8 }
 0x147   :  { %1285 = vmatprep.subr.mxu0 %v1465_v3 }
 0x148   :  { %1286 = vmatpush3.msra.mxu0 %v1567_v15 }
 0x149   :  { %1301 = vmatprep.subr.mxu0 %v1465_v3 }
 0x201   :  { %v196_v21 = vpop.f32.mrf.mxu0 }
 0x202   :  { %v1595_v22 = vadd.f32 %v1181_v20, %v196_v21 }
 0x203   :  { %v1267_v23 = vpop.f32.mrf.mxu0 }
 0x204   :  { %v278_v24 = vadd.f32 %v274_v18, %v1595_v22 }
 0x206   :  { %1374 = vtanh.f32 %v278_v24  ;;  %v1183_v26 = vmul.f32 -1.442695, %v278_v24 }
 0x208   :  { %1376 = vpow2.f32 %v1183_v26 }
 0x213   :  { %v1375_v25 = vpop.eup %1374 }
 0x214   :  { %288 = vrot.lane.b32.xlu0 %v1375_v25, %s1467_s19 }
 0x215   :  { %v1377_v27 = vpop.eup %1376 }
 0x216   :  { %v282_v28 = vadd.f32 1.0, %v1377_v27 }
 0x218   :  { %1378 = vrcp.f32 %v282_v28 }
 0x225   :  { %v1379_v29 = vpop.eup %1378 }
 0x226   :  { %v286_v32 = vmul.f32 0.0, %v1379_v29 }
 0x286   :  { %v289_v30 = vpop.permute.xlu0 %288 }
 0x287   :  { %v291_v31 = vmul.f32 %v1379_v29, %v289_v30 }
 0x289   :  { %293 = vrot.lane.b32.xlu1 %v291_v31, %s1468_s4 }
 0x2fb   :  { %v294_v33 = vpop.permute.xlu1 %293 }
 0x2fc   :  { %v296_v34 = vadd.f32 %v294_v33, %v286_v32 }
 0x2fe   :  { %1380 = vtanh.f32 %v296_v34  ;;  %v390_v50 = vrot.slane %v296_v34, 7 }
 0x30b   :  { %v1381_v35 = vpop.eup %1380 }
 0x30c   :  { %299 = vrot.lane.b32.xlu1 %v1381_v35, %s1467_s19 }
 0x37e   :  { %v300_v36 = vpop.permute.xlu1 %299 }
 0x37f   :  { %v1601_v37 = vmul.f32 %v1379_v29, %v300_v36 }
 0x381   :  { %304 = vrot.lane.b32.xlu0 %v1601_v37, %s1468_s4 }
 0x3f3   :  { %v305_v38 = vpop.permute.xlu0 %304 }
 0x3f4   :  { %1288 = vmatmul.mubr.msk.f32.vlgmr.msra.gmra.mxu0 %vm204_vm5, %v305_v38 }
 0x3f5   :  { %1302 = vmatpush3.msra.mxu0 %v1524_v5  ;;  %1309 = vmatprep.mubr.msk.f32.mxu0 %vm1466_vm1, %v1465_v3 }
 0x3f6   :  { %1303 = vmatprep.subr.mxu0 %v1465_v3 }
 0x3f7   :  { %1304 = vmatpush3.msra.mxu0 %v1536_v7 }
 0x3f8   :  { %1305 = vmatprep.subr.mxu0 %v1465_v3 }
 0x3f9   :  { %1306 = vmatpush3.msra.mxu0 %v1544_v8 }
 0x3fa   :  { %1307 = vmatprep.subr.mxu0 %v1465_v3 }
 0x3fb   :  { %1308 = vmatpush3.msra.mxu0 %v1567_v15 }
 0x3fc   :  { %1323 = vmatprep.subr.mxu0 %v1465_v3 }
 0x4b4   :  { %v374_v39 = vpop.f32.mrf.mxu0 }
 0x4b5   :  { %v379_v40 = vrot.slane %v374_v39, 7 }
 0x4b6   :  { %v1289_v41 = vpop.f32.mrf.mxu0 }
 0x4b7   :  { %v381_v42 = vadd.f32 %v379_v40, %v1595_v22 }
 0x4b9   :  { %1382 = vtanh.f32 %v381_v42  ;;  %v1185_v44 = vmul.f32 -1.442695, %v381_v42 }
 0x4bb   :  { %1384 = vpow2.f32 %v1185_v44 }
 0x4c6   :  { %v1383_v43 = vpop.eup %1382 }
 0x4c7   :  { %394 = vrot.lane.b32.xlu1 %v1383_v43, %s1467_s19 }
 0x4c8   :  { %v1385_v45 = vpop.eup %1384 }
 0x4c9   :  { %v385_v46 = vadd.f32 1.0, %v1385_v45 }
 0x4cb   :  { %1386 = vrcp.f32 %v385_v46 }
 0x4d8   :  { %v1387_v47 = vpop.eup %1386 }
 0x4d9   :  { %v392_v51 = vmul.f32 %v1387_v47, %v390_v50 }
 0x539   :  { %v395_v48 = vpop.permute.xlu1 %394 }
 0x53a   :  { %v397_v49 = vmul.f32 %v1387_v47, %v395_v48 }
 0x53c   :  { %399 = vrot.lane.b32.xlu0 %v397_v49, %s1468_s4 }
 0x5ae   :  { %v400_v52 = vpop.permute.xlu0 %399 }
 0x5af   :  { %v402_v53 = vadd.f32 %v400_v52, %v392_v51 }
 0x5b1   :  { %1388 = vtanh.f32 %v402_v53  ;;  %v497_v10 = vrot.slane %v402_v53, 7 }
 0x5be   :  { %v1389_v54 = vpop.eup %1388 }
 0x5bf   :  { %405 = vrot.lane.b32.xlu1 %v1389_v54, %s1467_s19 }
 0x631   :  { %v406_v55 = vpop.permute.xlu1 %405 }
 0x632   :  { %v408_v56 = vmul.f32 %v1387_v47, %v406_v55 }
 0x634   :  { %v410_v57 = vrot.slane %v408_v56, 1  ;;  %v1052_v18 = vsel %vm1051_vm6, %v1601_v37, %v408_v56 }
 0x636   :  { %411 = vrot.lane.b32.xlu0 %v410_v57, %s1468_s4 }
 0x6a8   :  { %v412_v58 = vpop.permute.xlu0 %411 }
 0x6a9   :  { %1299 = vmatmul.mubr.msk.f32.vlgmr.msra.gmra.mxu1 %vm204_vm5, %v412_v58 }
 0x6aa   :  { %1313 = vmatpush3.msra.mxu1 %v1524_v5  ;;  %1320 = vmatprep.mubr.msk.f32.mxu1 %vm1466_vm1, %v1465_v3 }
 0x6ab   :  { %1314 = vmatprep.subr.mxu1 %v1465_v3 }
 0x6ac   :  { %1315 = vmatpush3.msra.mxu1 %v1536_v7 }
 0x6ad   :  { %1316 = vmatprep.subr.mxu1 %v1465_v3 }
 0x6ae   :  { %1317 = vmatpush3.msra.mxu1 %v1544_v8 }
 0x6af   :  { %1318 = vmatprep.subr.mxu1 %v1465_v3 }
 0x6b0   :  { %1319 = vmatpush3.msra.mxu1 %v1567_v15 }
 0x6b1   :  { %1334 = vmatprep.subr.mxu1 %v1465_v3 }
 0x769   :  { %v481_v59 = vpop.f32.mrf.mxu1 }
 0x76a   :  { %v486_v60 = vrot.slane %v481_v59, 6 }
 0x76b   :  { %v1300_v61 = vpop.f32.mrf.mxu1 }
 0x76c   :  { %v488_v62 = vadd.f32 %v486_v60, %v1595_v22 }
 0x76e   :  { %1390 = vtanh.f32 %v488_v62  ;;  %v1187_v0 = vmul.f32 -1.442695, %v488_v62 }
 0x770   :  { %1392 = vpow2.f32 %v1187_v0 }
 0x77b   :  { %v1391_v63 = vpop.eup %1390 }
 0x77c   :  { %501 = vrot.lane.b32.xlu1 %v1391_v63, %s1467_s19 }
 0x77d   :  { %v1393_v1 = vpop.eup %1392 }
 0x77e   :  { %v492_v2 = vadd.f32 1.0, %v1393_v1 }
 0x780   :  { %1394 = vrcp.f32 %v492_v2 }
 0x78d   :  { %v1395_v4 = vpop.eup %1394 }
 0x78e   :  { %v499_v11 = vmul.f32 %v1395_v4, %v497_v10 }
 0x7ee   :  { %v502_v6 = vpop.permute.xlu1 %501 }
 0x7ef   :  { %v504_v9 = vmul.f32 %v1395_v4, %v502_v6 }
 0x7f1   :  { %506 = vrot.lane.b32.xlu0 %v504_v9, %s1468_s4 }
 0x863   :  { %v507_v12 = vpop.permute.xlu0 %506 }
 0x864   :  { %v509_v13 = vadd.f32 %v507_v12, %v499_v11 }
 0x866   :  { %1396 = vtanh.f32 %v509_v13  ;;  %v604_v34 = vrot.slane %v509_v13, 7 }
 0x873   :  { %v1397_v14 = vpop.eup %1396 }
 0x874   :  { %512 = vrot.lane.b32.xlu1 %v1397_v14, %s1467_s19 }
 0x8e6   :  { %v513_v16 = vpop.permute.xlu1 %512 }
 0x8e7   :  { %v515_v17 = vmul.f32 %v1395_v4, %v513_v16 }
 0x8e9   :  { %v517_v19 = vrot.slane %v515_v17, 2  ;;  %v1054_v20 = vsel %vm1053_vm7, %v1052_v18, %v515_v17 }
 0x8eb   :  { %518 = vrot.lane.b32.xlu0 %v517_v19, %s1468_s4 }
 0x95d   :  { %v519_v21 = vpop.permute.xlu0 %518 }
 0x95e   :  { %1310 = vmatmul.mubr.msk.f32.vlgmr.msra.gmra.mxu0 %vm204_vm5, %v519_v21 }
 0x95f   :  { %1324 = vmatpush3.msra.mxu0 %v1524_v5  ;;  %1331 = vmatprep.mubr.msk.f32.mxu0 %vm1466_vm1, %v1465_v3 }
 0x960   :  { %1325 = vmatprep.subr.mxu0 %v1465_v3 }
 0x961   :  { %1326 = vmatpush3.msra.mxu0 %v1536_v7 }
 0x962   :  { %1327 = vmatprep.subr.mxu0 %v1465_v3 }
 0x963   :  { %1328 = vmatpush3.msra.mxu0 %v1544_v8 }
 0x964   :  { %1329 = vmatprep.subr.mxu0 %v1465_v3 }
 0x965   :  { %1330 = vmatpush3.msra.mxu0 %v1567_v15 }
 0x966   :  { %1345 = vmatprep.subr.mxu0 %v1465_v3 }
 0xa1e   :  { %v588_v23 = vpop.f32.mrf.mxu0 }
 0xa1f   :  { %v593_v24 = vrot.slane %v588_v23, 5 }
 0xa20   :  { %v1311_v25 = vpop.f32.mrf.mxu0 }
 0xa21   :  { %v595_v26 = vadd.f32 %v593_v24, %v1595_v22 }
 0xa23   :  { %1398 = vtanh.f32 %v595_v26  ;;  %v1189_v28 = vmul.f32 -1.442695, %v595_v26 }
 0xa25   :  { %1400 = vpow2.f32 %v1189_v28 }
 0xa30   :  { %v1399_v27 = vpop.eup %1398 }
 0xa31   :  { %608 = vrot.lane.b32.xlu1 %v1399_v27, %s1467_s19 }
 0xa32   :  { %v1401_v29 = vpop.eup %1400 }
 0xa33   :  { %v599_v30 = vadd.f32 1.0, %v1401_v29 }
 0xa35   :  { %1402 = vrcp.f32 %v599_v30 }
 0xa42   :  { %v1403_v31 = vpop.eup %1402 }
 0xa43   :  { %v606_v35 = vmul.f32 %v1403_v31, %v604_v34 }
 0xaa3   :  { %v609_v32 = vpop.permute.xlu1 %608 }
 0xaa4   :  { %v611_v33 = vmul.f32 %v1403_v31, %v609_v32 }
 0xaa6   :  { %613 = vrot.lane.b32.xlu0 %v611_v33, %s1468_s4 }
 0xb18   :  { %v614_v36 = vpop.permute.xlu0 %613 }
 0xb19   :  { %v616_v37 = vadd.f32 %v614_v36, %v606_v35 }
 0xb1b   :  { %1404 = vtanh.f32 %v616_v37  ;;  %v711_v55 = vrot.slane %v616_v37, 7 }
 0xb28   :  { %v1405_v38 = vpop.eup %1404 }
 0xb29   :  { %619 = vrot.lane.b32.xlu1 %v1405_v38, %s1467_s19 }
 0xb9b   :  { %v620_v39 = vpop.permute.xlu1 %619 }
 0xb9c   :  { %v622_v40 = vmul.f32 %v1403_v31, %v620_v39 }
 0xb9e   :  { %v624_v41 = vrot.slane %v622_v40, 3  ;;  %v1056_v42 = vsel %vm1055_vm8, %v1054_v20, %v622_v40 }
 0xba0   :  { %625 = vrot.lane.b32.xlu0 %v624_v41, %s1468_s4 }
 0xc12   :  { %v626_v43 = vpop.permute.xlu0 %625 }
 0xc13   :  { %1321 = vmatmul.mubr.msk.f32.vlgmr.msra.gmra.mxu1 %vm204_vm5, %v626_v43 }
 0xc14   :  { %1335 = vmatpush3.msra.mxu1 %v1524_v5  ;;  %1342 = vmatprep.mubr.msk.f32.mxu1 %vm1466_vm1, %v1465_v3 }
 0xc15   :  { %1336 = vmatprep.subr.mxu1 %v1465_v3 }
 0xc16   :  { %1337 = vmatpush3.msra.mxu1 %v1536_v7 }
 0xc17   :  { %1338 = vmatprep.subr.mxu1 %v1465_v3 }
 0xc18   :  { %1339 = vmatpush3.msra.mxu1 %v1544_v8 }
 0xc19   :  { %1340 = vmatprep.subr.mxu1 %v1465_v3 }
 0xc1a   :  { %1341 = vmatpush3.msra.mxu1 %v1567_v15 }
 0xc1b   :  { %1356 = vmatprep.subr.mxu1 %v1465_v3 }
 0xcd3   :  { %v695_v44 = vpop.f32.mrf.mxu1 }
 0xcd4   :  { %v700_v45 = vrot.slane %v695_v44, 4 }
 0xcd5   :  { %v1322_v46 = vpop.f32.mrf.mxu1 }
 0xcd6   :  { %v702_v47 = vadd.f32 %v700_v45, %v1595_v22 }
 0xcd8   :  { %1406 = vtanh.f32 %v702_v47  ;;  %v1191_v49 = vmul.f32 -1.442695, %v702_v47 }
 0xcda   :  { %1408 = vpow2.f32 %v1191_v49 }
 0xce5   :  { %v1407_v48 = vpop.eup %1406 }
 0xce6   :  { %715 = vrot.lane.b32.xlu1 %v1407_v48, %s1467_s19 }
 0xce7   :  { %v1409_v50 = vpop.eup %1408 }
 0xce8   :  { %v706_v51 = vadd.f32 1.0, %v1409_v50 }
 0xcea   :  { %1410 = vrcp.f32 %v706_v51 }
 0xcf7   :  { %v1411_v52 = vpop.eup %1410 }
 0xcf8   :  { %v713_v56 = vmul.f32 %v1411_v52, %v711_v55 }
 0xd58   :  { %v716_v53 = vpop.permute.xlu1 %715 }
 0xd59   :  { %v718_v54 = vmul.f32 %v1411_v52, %v716_v53 }
 0xd5b   :  { %720 = vrot.lane.b32.xlu0 %v718_v54, %s1468_s4 }
 0xdcd   :  { %v721_v57 = vpop.permute.xlu0 %720 }
 0xdce   :  { %v723_v58 = vadd.f32 %v721_v57, %v713_v56 }
 0xdd0   :  { %1412 = vtanh.f32 %v723_v58 }
 0xddd   :  { %v1413_v59 = vpop.eup %1412 }
 0xdde   :  { %726 = vrot.lane.b32.xlu1 %v1413_v59, %s1467_s19 }
 0xe50   :  { %v727_v60 = vpop.permute.xlu1 %726 }
 0xe51   :  { %v729_v61 = vmul.f32 %v1411_v52, %v727_v60  ;;  %v1066_v60 = vld [vmem:[%s1730_s5 + $0x10] sm:$0xff] }
 0xe53   :  { %v731_v62 = vrot.slane %v729_v61, 4  ;;  %v1057_v63 = vsel %vm43_vm0, %v1056_v42, %v729_v61  ;;  %v1065_v61 = vld [vmem:[%s1730_s5 + $0x8] sm:$0xff] }
 0xe55   :  { %732 = vrot.lane.b32.xlu0 %v731_v62, %s1468_s4  ;;  %v1064_v62 = vld [vmem:[%s1730_s5] sm:$0xff] }
 0xec7   :  { %v733_v0 = vpop.permute.xlu0 %732 }
 0xec8   :  { %1332 = vmatmul.mubr.msk.f32.vlgmr.msra.gmra.mxu0 %vm204_vm5, %v733_v0 }
 0xec9   :  { %1346 = vmatpush3.msra.mxu0 %v1524_v5  ;;  %1353 = vmatprep.mubr.msk.f32.mxu0 %vm1466_vm1, %v1465_v3 }
 0xeca   :  { %1347 = vmatprep.subr.mxu0 %v1465_v3 }
 0xecb   :  { %1348 = vmatpush3.msra.mxu0 %v1536_v7 }
 0xecc   :  { %1349 = vmatprep.subr.mxu0 %v1465_v3 }
 0xecd   :  { %1350 = vmatpush3.msra.mxu0 %v1544_v8 }
 0xece   :  { %1351 = vmatprep.subr.mxu0 %v1465_v3 }
 0xecf   :  { %1352 = vmatpush3.msra.mxu0 %v1567_v15  ;;  %v818_v15 = vrot.slane %v723_v58, 7 }
 0xf88   :  { %v802_v1 = vpop.f32.mrf.mxu0 }
 0xf89   :  { %v807_v2 = vrot.slane %v802_v1, 3 }
 0xf8a   :  { %v1333_v4 = vpop.f32.mrf.mxu0 }
 0xf8b   :  { %v809_v5 = vadd.f32 %v807_v2, %v1595_v22 }
 0xf8d   :  { %1414 = vtanh.f32 %v809_v5  ;;  %v1193_v9 = vmul.f32 -1.442695, %v809_v5  ;;  %v1198_v5 = vld [vmem:[%s1731_s6] ss:$0 sm:$0xff] }
 0xf8f   :  { %1416 = vpow2.f32 %v1193_v9 }
 0xf9a   :  { %v1415_v6 = vpop.eup %1414 }
 0xf9b   :  { %822 = vrot.lane.b32.xlu1 %v1415_v6, %s1467_s19 }
 0xf9c   :  { %v1417_v7 = vpop.eup %1416 }
 0xf9d   :  { %v813_v10 = vadd.f32 1.0, %v1417_v7 }
 0xf9f   :  { %1418 = vrcp.f32 %v813_v10 }
 0xfac   :  { %v1419_v11 = vpop.eup %1418 }
 0xfad   :  { %v820_v13 = vmul.f32 %v1419_v11, %v818_v15 }
0x100d   :  { %v823_v8 = vpop.permute.xlu1 %822 }
0x100e   :  { %v825_v12 = vmul.f32 %v1419_v11, %v823_v8 }
0x1010   :  { %827 = vrot.lane.b32.xlu0 %v825_v12, %s1468_s4 }
0x1082   :  { %v828_v14 = vpop.permute.xlu0 %827 }
0x1083   :  { %v830_v16 = vadd.f32 %v828_v14, %v820_v13 }
0x1085   :  { %1420 = vtanh.f32 %v830_v16  ;;  %v925_v35 = vrot.slane %v830_v16, 7 }
0x1092   :  { %v1421_v17 = vpop.eup %1420 }
0x1093   :  { %833 = vrot.lane.b32.xlu1 %v1421_v17, %s1467_s19 }
0x1105   :  { %v834_v18 = vpop.permute.xlu1 %833 }
0x1106   :  { %v836_v19 = vmul.f32 %v1419_v11, %v834_v18 }
0x1108   :  { %v838_v20 = vrot.slane %v836_v19, 5  ;;  %v1059_v21 = vsel %vm1058_vm9, %v1057_v63, %v836_v19 }
0x110a   :  { %839 = vrot.lane.b32.xlu0 %v838_v20, %s1468_s4 }
0x117c   :  { %v840_v23 = vpop.permute.xlu0 %839 }
0x117d   :  { %1343 = vmatmul.mubr.msk.f32.vlgmr.msra.gmra.mxu1 %vm204_vm5, %v840_v23 }
0x117e   :  { %1364 = vmatprep.mubr.msk.f32.mxu1 %vm1466_vm1, %v1465_v3 }
0x123d   :  { %v909_v24 = vpop.f32.mrf.mxu1 }
0x123e   :  { %v914_v25 = vrot.slane %v909_v24, 2 }
0x123f   :  { %v1344_v26 = vpop.f32.mrf.mxu1 }
0x1240   :  { %v916_v27 = vadd.f32 %v914_v25, %v1595_v22 }
0x1242   :  { %1422 = vtanh.f32 %v916_v27  ;;  %v1195_v29 = vmul.f32 -1.442695, %v916_v27 }
0x1244   :  { %1424 = vpow2.f32 %v1195_v29 }
0x124f   :  { %v1423_v28 = vpop.eup %1422 }
0x1250   :  { %929 = vrot.lane.b32.xlu1 %v1423_v28, %s1467_s19 }
0x1251   :  { %v1425_v30 = vpop.eup %1424 }
0x1252   :  { %v920_v31 = vadd.f32 1.0, %v1425_v30 }
0x1254   :  { %1426 = vrcp.f32 %v920_v31 }
0x1261   :  { %v1427_v32 = vpop.eup %1426 }
0x1262   :  { %v927_v36 = vmul.f32 %v1427_v32, %v925_v35 }
0x12c2   :  { %v930_v33 = vpop.permute.xlu1 %929 }
0x12c3   :  { %v932_v34 = vmul.f32 %v1427_v32, %v930_v33 }
0x12c5   :  { %934 = vrot.lane.b32.xlu0 %v932_v34, %s1468_s4 }
0x1337   :  { %v935_v37 = vpop.permute.xlu0 %934 }
0x1338   :  { %v937_v38 = vadd.f32 %v935_v37, %v927_v36 }
0x133a   :  { %1428 = vtanh.f32 %v937_v38  ;;  %v1032_v56 = vrot.slane %v937_v38, 7 }
0x1347   :  { %v1429_v39 = vpop.eup %1428 }
0x1348   :  { %940 = vrot.lane.b32.xlu1 %v1429_v39, %s1467_s19 }
0x13ba   :  { %v941_v40 = vpop.permute.xlu1 %940 }
0x13bb   :  { %v943_v41 = vmul.f32 %v1427_v32, %v941_v40 }
0x13bd   :  { %v945_v42 = vrot.slane %v943_v41, 6  ;;  %v1061_v43 = vsel %vm1060_vm10, %v1059_v21, %v943_v41 }
0x13bf   :  { %946 = vrot.lane.b32.xlu0 %v945_v42, %s1468_s4 }
0x1431   :  { %v947_v44 = vpop.permute.xlu0 %946 }
0x1432   :  { %1354 = vmatmul.mubr.msk.f32.vlgmr.msra.gmra.mxu0 %vm204_vm5, %v947_v44 }
0x14f2   :  { %v1016_v45 = vpop.f32.mrf.mxu0 }
0x14f3   :  { %v1021_v46 = vrot.slane %v1016_v45, 1 }
0x14f4   :  { %v1355_v47 = vpop.f32.mrf.mxu0 }
0x14f5   :  { %v1023_v48 = vadd.f32 %v1021_v46, %v1595_v22  ;;  %v1067_v22 = vld [vmem:[%s1730_s5 + $0x18] sm:$0xff]  ;;  %s1469_s5 = smov [#allocation2]  }
0x14f6   :  { %1357 = vmatpush3.msra.mxu1 %v1067_v22  ;;  %s1170_s6 = sshll.u32 %s1469_s5, 4  ;;  %s1171_s6 = int_to_ptr.vmem [resolvable:$true] %s1170_s6 }
0x14f7   :  { %1430 = vtanh.f32 %v1023_v48  ;;  %v1197_v50 = vmul.f32 -1.442695, %v1023_v48  ;;  %1358 = vmatprep.subr.mxu1 %v1465_v3  ;;  %s1442_s30 = scalar_lea.vmem %s1171_s6, 128  ;;  %p1447_p1 = scmp.lt.s32.totalorder %s1171_s6, %s1171_s6 }
0x14f8   :  { %1359 = vmatpush3.msra.mxu1 %v1066_v60  ;;  %p1443_p0 = scmp.ne.s32.totalorder %s1171_s6, %s1442_s30  ;;  %p1448_p2 = scmp.lt.s32.totalorder %s1442_s30, %s1442_s30 }
0x14f9   :  { %1432 = vpow2.f32 %v1197_v50  ;;  %1360 = vmatprep.subr.mxu1 %v1465_v3 }
0x14fa   :  { %1361 = vmatpush3.msra.mxu1 %v1065_v61  ;;  %p1449_p3 = por %p1448_p2, %p1447_p1 }
0x14fb   :  { %1362 = vmatprep.subr.mxu1 %v1465_v3 }
0x14fc   :  { %1363 = vmatpush3.msra.mxu1 %v1064_v62  ;;  %p1450_p4 = pnand %p1449_p3, %p1443_p0 }
0x1504   :  { %v1431_v49 = vpop.eup %1430 }
0x1505   :  { %1036 = vrot.lane.b32.xlu1 %v1431_v49, %s1467_s19 }
0x1506   :  { %v1433_v51 = vpop.eup %1432 }
0x1507   :  { %v1027_v52 = vadd.f32 1.0, %v1433_v51 }
0x1509   :  { %1434 = vrcp.f32 %v1027_v52 }
0x1516   :  { %v1435_v53 = vpop.eup %1434 }
0x1517   :  { %v1034_v57 = vmul.f32 %v1435_v53, %v1032_v56 }
0x1577   :  { %v1037_v54 = vpop.permute.xlu1 %1036 }
0x1578   :  { %v1039_v55 = vmul.f32 %v1435_v53, %v1037_v54 }
0x157a   :  { %1041 = vrot.lane.b32.xlu0 %v1039_v55, %s1468_s4 }
0x15ec   :  { %v1042_v58 = vpop.permute.xlu0 %1041 }
0x15ed   :  { %v1044_v59 = vadd.f32 %v1042_v58, %v1034_v57 }
0x15ef   :  { %1436 = vtanh.f32 %v1044_v59 }
0x15fc   :  { %v1437_v63 = vpop.eup %1436 }
0x15fd   :  { %1047 = vrot.lane.b32.xlu1 %v1437_v63, %s1467_s19 }
0x166f   :  { %v1048_v0 = vpop.permute.xlu1 %1047 }
0x1670   :  { %v1050_v1 = vmul.f32 %v1435_v53, %v1048_v0 }
0x1672   :  { %v1063_v2 = vsel %vm1062_vm11, %v1061_v43, %v1050_v1 }
0x1673   :  { %1076 = vrot.lane.b32.xlu0 %v1063_v2, %s1468_s4 }
0x16e5   :  { %v1077_v4 = vpop.permute.xlu0 %1076 }
0x16e6   :  { %1365 = vmatmul.mubr.msk.f32.vlgmr.msra.gmra.mxu1 %vm204_vm5, %v1077_v4 }
0x17a6   :  { %v1146_v6 = vpop.f32.mrf.mxu1 }
0x17a7   :  { %v1147_v3 = vadd.f32 %v1198_v5, %v1146_v6 }
0x17a8   :  { %v1366_v9 = vpop.f32.mrf.mxu1 }
0x17a9   :  { %v1151_v7 = vsel %vm1150_vm12, %v1147_v3, -inf }
0x17aa   :  { %1152 = vmax.xlane.f32.xlu1 %v1151_v7 }
0x1833   :  { %v1153_v10 = vpop.xlane.xlu1 %1152 }
0x1834   :  { %v1154_v11 = vsub.f32 %v1147_v3, %v1153_v10 }
0x1836   :  { %v1155_v8 = vmul.f32 1.442695, %v1154_v11 }
0x1838   :  { %1438 = vpow2.f32 %v1155_v8 }
0x1845   :  { %v1439_v12 = vpop.eup %1438 }
0x1846   :  { %v1157_v15 = vsel %vm1150_vm12, %v1439_v12, 0.0 }
0x1847   :  { %1158 = vadd.xlane.f32.xlu0 %v1157_v15 }
0x18d0   :  { %v1159_v13 = vpop.xlane.xlu0 %1158 }
0x18d1   :  { %1440 = vlog2.f32 %v1159_v13 }
0x18de   :  { %v1441_v14 = vpop.eup %1440 }
0x18df   :  { %v1161_v16 = vmul.f32 0.6931472, %v1441_v14 }
0x18e1   :  { %v1162_v17 = vsub.f32 %v1154_v11, %v1161_v16 }
0x18e3   :  { %1163 = vst.msk [vmem:[#allocation2] sm:$0xff] %vm1150_vm12, %v1162_v17 }
0x18e4   :  { %1453 = shalt.err (!%p1450_p4)
}
0x18e5   :  { %1173 = dma.vmem_to_hbm [thread:$0]  %s1171_s6, 128, %s1732_s7, [#allocation3]  }
0x18e6   :  { %1462 = dma.done.wait [#allocation3], 128  }
0x18e7   :  { %1463 = vsyncadd [#allocation3], 4294967168 }
0x18e8   :  { %1177 = vsyncpa [#allocation3], 1 }

</bundles_post_ra>
